<compile_context>
chip_gen: v7x
topology: tpu7x:2x2x1
jax: 0.10.0
libtpu: 0.0.40
codegen_flags: <defaults>
</compile_context>

<pallas_src>
import functools
import math

import jax
import jax.numpy as jnp
from jax.experimental import pallas as pl
from jax.experimental.pallas import tpu as pltpu


def _lacombined_down_kernel(xT_ref, adjT_ref, pT_ref, qT_ref, bias_ref, a_ref,
                            out_ref, *, tk):
    k = pl.program_id(1)

    @pl.when(k == 0)
    def _init():
        out_ref[...] = jnp.zeros_like(out_ref)

    # Slice the k-th contraction chunk out of the fully-resident x^T (lane-aligned).
    k_off = pl.multiple_of(k * tk, tk)
    x_blk = xT_ref[:, pl.ds(k_off, tk)]                       # [n_p, TK] bf16

    # agg^T tile: [n_p, TK](bf16) @ [TK, TN](bf16) -> f32 accumulate directly into out.
    out_ref[...] += jnp.dot(x_blk, adjT_ref[...],
                            preferred_element_type=jnp.float32)

    @pl.when(k == pl.num_programs(1) - 1)
    def _finalize():
        # p_prime^T = agg^T + bias + a * p^T   (bias/a broadcast over the lane/node axis)
        p_prime = out_ref[...] + bias_ref[...] + a_ref[...] * pT_ref[...]
        out_ref[...] = qT_ref[...] + jnp.tanh(p_prime)


def _round_up(x, m):
    return ((x + m - 1) // m) * m


def _pick_tiles(N, max_tn=2048, max_tk=1024):
    """Pick (TN, TK, N_padded).  TN, TK are powers of two >= 128 with TK <= TN."""
    base = _round_up(N, 128)
    tn = min(max_tn, pl.next_power_of_2(base))
    # v7x megacore: prefer >= 2 output tiles on the "parallel" axis when possible.
    if tn > 128 and _round_up(N, tn) // tn < 2:
        tn //= 2
    tk = min(max_tk, tn)
    N_p = _round_up(N, tn)            # tk | tn (powers of two) => tk | N_p as well
    return tn, tk, N_p


def lacombined_down(p, q, edge_index, w, mp_bias, a, *, max_tn=2048, max_tk=1024):
    """p, q: [N, n] f32; edge_index: [2, E] int; w: [n, n]; mp_bias: [n]; a: [1, n]."""
    N, n = p.shape
    row, col = edge_index[0], edge_index[1]

    tn, tk, N_p = _pick_tiles(N, max_tn=max_tn, max_tk=max_tk)
    n_p = _round_up(n, 16)            # bf16 packs 16 sublanes per vreg
    grid = (N_p // tn, N_p // tk)     # (output node tiles, contraction tiles)

    # ---- XLA glue: GCN normalization + dense transposed adjacency (single pass) ------
    deg = jnp.zeros((N,), dtype=jnp.float32).at[col].add(1.0)
    deg_inv_sqrt = jnp.where(deg > 0, jax.lax.rsqrt(jnp.maximum(deg, 1.0)), 0.0)
    norm = deg_inv_sqrt[row] * deg_inv_sqrt[col]                          # [E]
    # agg = A @ x with A[col, row] += norm  =>  the kernel consumes A^T.
    # Scatter straight into the PADDED shape in f32 (duplicates accumulate exactly),
    # then cast to bf16 exactly once — no separate pad or extra N^2 passes.
    adjT_p = (jnp.zeros((N_p, N_p), dtype=jnp.float32)
              .at[row, col].add(norm)
              .astype(jnp.bfloat16))                                      # [N_p, N_p]

    w_sym = (w + w.T).astype(jnp.float32)                                 # hoisted
    x = p.astype(jnp.float32) @ w_sym                                     # [N, n] hoisted

    pT = jnp.pad(p.astype(jnp.float32), ((0, N_p - N), (0, n_p - n))).T   # [n_p, N_p]
    qT = jnp.pad(q.astype(jnp.float32), ((0, N_p - N), (0, n_p - n))).T   # [n_p, N_p]
    xT = jnp.pad(x, ((0, N_p - N), (0, n_p - n))).T.astype(jnp.bfloat16)  # [n_p, N_p]

    bias_col = jnp.pad(mp_bias.astype(jnp.float32).reshape(n, 1),
                       ((0, n_p - n), (0, 0)))                            # [n_p, 1]
    a_col = jnp.pad(a.astype(jnp.float32).reshape(n, 1),
                    ((0, n_p - n), (0, 0)))                               # [n_p, 1]

    # VMEM budget: adjacency double buffer + resident x^T + (p^T, q^T, out) tiles.
    est_bytes = (2 * tk * tn * 2            # A^T double buffer (bf16)
                 + 2 * n_p * N_p * 2        # x^T resident (bf16, allow 2 bufs)
                 + 3 * 2 * n_p * tn * 4     # p^T, q^T, out (f32, double buffered)
                 + (1 << 20))               # slack
    vmem_limit = min(max(32 << 20, 2 * est_bytes), 64 << 20)

    qT_out = pl.pallas_call(
        functools.partial(_lacombined_down_kernel, tk=tk),
        out_shape=jax.ShapeDtypeStruct((n_p, N_p), jnp.float32),
        grid_spec=pltpu.PrefetchScalarGridSpec(
            num_scalar_prefetch=0,
            grid=grid,
            in_specs=[
                pl.BlockSpec((n_p, N_p), lambda i, k: (0, 0)),   # x^T, fully resident
                pl.BlockSpec((tk, tn), lambda i, k: (k, i)),     # A^T (dominant DMA)
                pl.BlockSpec((n_p, tn), lambda i, k: (0, i)),    # p^T (once per out tile)
                pl.BlockSpec((n_p, tn), lambda i, k: (0, i)),    # q^T
                pl.BlockSpec((n_p, 1), lambda i, k: (0, 0)),     # mp_bias column
                pl.BlockSpec((n_p, 1), lambda i, k: (0, 0)),     # a column
            ],
            out_specs=pl.BlockSpec((n_p, tn), lambda i, k: (0, i)),
            scratch_shapes=[],   # output tile doubles as the f32 accumulator
        ),
        compiler_params=pltpu.CompilerParams(
            dimension_semantics=("parallel", "arbitrary"),
            vmem_limit_bytes=vmem_limit,
        ),
    )(xT, adjT_p, pT, qT, bias_col, a_col)

    q_new = qT_out[:n, :N].T
    return p, q_new


# --------------------------- references for validation ----------------------------------
def _reference_exact(p, q, edge_index, w, mp_bias, a):
    """Exact f32 math of the PyTorch module."""
    N, n = p.shape
    row, col = edge_index[0], edge_index[1]
    x = p @ (w + w.T)
    deg = jnp.zeros((N,), p.dtype).at[col].add(1.0)
    dis = jnp.where(deg > 0, deg ** -0.5, 0.0)
    norm = dis[row] * dis[col]
    agg = jnp.zeros((N, n), p.dtype).at[col].add(norm[:, None] * x[row])
    p_prime = agg + mp_bias[None, :] + a.reshape(1, n) * p
    return p, q + jnp.tanh(p_prime)


def _reference_kernel_precision(p, q, edge_index, w, mp_bias, a):
    """Same math, but with the bf16-rounded A / x the kernel consumes (f32 accumulate)."""
    N, n = p.shape
    row, col = edge_index[0], edge_index[1]
    x = (p @ (w + w.T)).astype(jnp.bfloat16).astype(jnp.float32)
    deg = jnp.zeros((N,), jnp.float32).at[col].add(1.0)
    dis = jnp.where(deg > 0, jax.lax.rsqrt(jnp.maximum(deg, 1.0)), 0.0)
    norm = dis[row] * dis[col]
    adj = jnp.zeros((N, N), jnp.float32).at[col, row].add(norm)
    adj = adj.astype(jnp.bfloat16).astype(jnp.float32)
    agg = adj @ x
    p_prime = agg + mp_bias[None, :] + a.reshape(1, n) * p
    return p, q + jnp.tanh(p_prime)


if __name__ == "__main__":
    key = jax.random.PRNGKey(0)
    k_p, k_q, k_e, k_w = jax.random.split(key, 4)

    N, n, E = 16, 8, 32   # small shapes: 16 nodes, 8 features, 32 edges

    p = jax.random.normal(k_p, (N, n), dtype=jnp.float32)
    q = jax.random.normal(k_q, (N, n), dtype=jnp.float32)
    edge_index = jax.random.randint(k_e, (2, E), 0, N, dtype=jnp.int32)

    # Parameters (deterministic, per module __init__ / reset_parameters):
    bound = 1.0 / math.sqrt(n)
    w = jax.random.uniform(k_w, (n, n), minval=-bound, maxval=bound, dtype=jnp.float32)
    mp_bias = jnp.zeros((n,), dtype=jnp.float32)   # zeroed in reset_parameters
    a = jnp.ones((1, n), dtype=jnp.float32)        # torch.ones((1, n))

    p_out, q_out = lacombined_down(p, q, edge_index, w, mp_bias, a)
    jax.block_until_ready((p_out, q_out))

    # p passes through untouched.
    assert jnp.array_equal(p_out, p), "p mismatch"

    # Tight check: reference using the same bf16-rounded A^T / x^T (validates the kernel).
    _, q_tight = _reference_kernel_precision(p, q, edge_index, w, mp_bias, a)
    assert jnp.allclose(q_out, q_tight, atol=1e-4), "q mismatch (kernel-precision ref)"

    # Loose check: exact f32 module math (bf16 adjacency/x costs ~1e-3 absolute).
    _, q_exact = _reference_exact(p, q, edge_index, w, mp_bias, a)
    assert jnp.allclose(q_out, q_exact, atol=2e-2), "q mismatch (exact f32 ref)"

    print("KERNEL_OK")
</pallas_src>

<mosaic_0001>
module attributes {stable_mosaic.version = 11 : i64} {
  func.func @_lacombined_down_kernel(%arg0: i32, %arg1: i32, %arg2: memref<16x128xbf16, #tpu.memory_space<vmem>>, %arg3: memref<128x128xbf16, #tpu.memory_space<vmem>>, %arg4: memref<16x128xf32, #tpu.memory_space<vmem>>, %arg5: memref<16x128xf32, #tpu.memory_space<vmem>>, %arg6: memref<16x1xf32, #tpu.memory_space<vmem>>, %arg7: memref<16x1xf32, #tpu.memory_space<vmem>>, %arg8: memref<16x128xf32, #tpu.memory_space<vmem>>) attributes {dimension_semantics = [#tpu.dimension_semantics<parallel>, #tpu.dimension_semantics<arbitrary>], iteration_bounds = array<i64: 1, 1>, scalar_prefetch = 0 : i64, scratch_operands = 0 : i64, tpu.core_type = #tpu.core_type<tc>, window_params = [{pipeline_mode = #tpu.pipeline_mode<synchronous>, transform_indices = @transform_0, window_bounds = array<i64: 16, 128>}, {transform_indices = @transform_1, window_bounds = array<i64: 128, 128>}, {transform_indices = @transform_2, window_bounds = array<i64: 16, 128>}, {transform_indices = @transform_3, window_bounds = array<i64: 16, 128>}, {pipeline_mode = #tpu.pipeline_mode<synchronous>, transform_indices = @transform_4, window_bounds = array<i64: 16, 1>}, {pipeline_mode = #tpu.pipeline_mode<synchronous>, transform_indices = @transform_5, window_bounds = array<i64: 16, 1>}, {transform_indices = @transform_6, window_bounds = array<i64: 16, 128>}]} {
    %c0_i32 = arith.constant 0 : i32
    %0 = arith.cmpi eq, %arg1, %c0_i32 : i32
    %1 = arith.extui %0 : i1 to i32
    %c0_i32_0 = arith.constant 0 : i32
    %2 = arith.cmpi ne, %1, %c0_i32_0 : i32
    scf.if %2 {
      %cst_9 = arith.constant 0.000000e+00 : f32
      %15 = vector.broadcast %cst_9 : f32 to vector<16x128xf32>
      %c0_10 = arith.constant 0 : index
      %c0_11 = arith.constant 0 : index
      %16 = vector.load %arg8[%c0_10, %c0_11] : memref<16x128xf32, #tpu.memory_space<vmem>>, vector<16x128xf32>
      tpu.vector_store %arg8[%c0_10, %c0_11], %15 {strides = array<i32>} : memref<16x128xf32, #tpu.memory_space<vmem>>, vector<16x128xf32>,
    } else {
    }
    %c128_i32 = arith.constant 128 : i32
    %3 = arith.muli %arg1, %c128_i32 : i32
    %4 = tpu.assume_multiple %3, 128 : i32
    %c0 = arith.constant 0 : index
    %5 = arith.index_cast %4 : i32 to index
    %6 = vector.load %arg2[%c0, %5] : memref<16x128xbf16, #tpu.memory_space<vmem>>, vector<16x128xbf16>
    %c0_1 = arith.constant 0 : index
    %c0_2 = arith.constant 0 : index
    %7 = vector.load %arg8[%c0_1, %c0_2] : memref<16x128xf32, #tpu.memory_space<vmem>>, vector<16x128xf32>
    %c0_3 = arith.constant 0 : index
    %c0_4 = arith.constant 0 : index
    %8 = vector.load %arg3[%c0_3, %c0_4] : memref<128x128xbf16, #tpu.memory_space<vmem>>, vector<128x128xbf16>
    %cst = arith.constant dense<0.000000e+00> : vector<16x128xf32>
    %9 = tpu.matmul %6, %8, %cst {dimension_numbers = #tpu.dot_dimension_numbers<[1], [0], [0], [1], [0, 0, 1, 1], [], []>} : vector<16x128xbf16>, vector<128x128xbf16>, vector<16x128xf32> -> vector<16x128xf32>
    %10 = arith.addf %7, %9 : vector<16x128xf32>
    %c0_5 = arith.constant 0 : index
    %c0_6 = arith.constant 0 : index
    %11 = vector.load %arg8[%c0_5, %c0_6] : memref<16x128xf32, #tpu.memory_space<vmem>>, vector<16x128xf32>
    tpu.vector_store %arg8[%c0_5, %c0_6], %10 {strides = array<i32>} : memref<16x128xf32, #tpu.memory_space<vmem>>, vector<16x128xf32>,
    %c0_i32_7 = arith.constant 0 : i32
    %12 = arith.cmpi eq, %arg1, %c0_i32_7 : i32
    %13 = arith.extui %12 : i1 to i32
    %c0_i32_8 = arith.constant 0 : i32
    %14 = arith.cmpi ne, %13, %c0_i32_8 : i32
    scf.if %14 {
      %c0_9 = arith.constant 0 : index
      %c0_10 = arith.constant 0 : index
      %15 = vector.load %arg8[%c0_9, %c0_10] : memref<16x128xf32, #tpu.memory_space<vmem>>, vector<16x128xf32>
      %c0_11 = arith.constant 0 : index
      %c0_12 = arith.constant 0 : index
      %16 = vector.load %arg6[%c0_11, %c0_12] : memref<16x1xf32, #tpu.memory_space<vmem>>, vector<16x1xf32>
      %17 = vector.broadcast %16 : vector<16x1xf32> to vector<16x128xf32>
      %18 = arith.addf %15, %17 : vector<16x128xf32>
      %c0_13 = arith.constant 0 : index
      %c0_14 = arith.constant 0 : index
      %19 = vector.load %arg7[%c0_13, %c0_14] : memref<16x1xf32, #tpu.memory_space<vmem>>, vector<16x1xf32>
      %c0_15 = arith.constant 0 : index
      %c0_16 = arith.constant 0 : index
      %20 = vector.load %arg4[%c0_15, %c0_16] : memref<16x128xf32, #tpu.memory_space<vmem>>, vector<16x128xf32>
      %21 = vector.broadcast %19 : vector<16x1xf32> to vector<16x128xf32>
      %22 = arith.mulf %21, %20 : vector<16x128xf32>
      %23 = arith.addf %18, %22 : vector<16x128xf32>
      %c0_17 = arith.constant 0 : index
      %c0_18 = arith.constant 0 : index
      %24 = vector.load %arg5[%c0_17, %c0_18] : memref<16x128xf32, #tpu.memory_space<vmem>>, vector<16x128xf32>
      %25 = math.tanh %23 : vector<16x128xf32>
      %26 = arith.addf %24, %25 : vector<16x128xf32>
      %c0_19 = arith.constant 0 : index
      %c0_20 = arith.constant 0 : index
      %27 = vector.load %arg8[%c0_19, %c0_20] : memref<16x128xf32, #tpu.memory_space<vmem>>, vector<16x128xf32>
      tpu.vector_store %arg8[%c0_19, %c0_20], %26 {strides = array<i32>} : memref<16x128xf32, #tpu.memory_space<vmem>>, vector<16x128xf32>,
    } else {
    }
    return
  }
  func.func @transform_0(%arg0: i32, %arg1: i32) -> (i32, i32) {
    %c0_i32 = arith.constant 0 : i32
    %c0_i32_0 = arith.constant 0 : i32
    %c0_i32_1 = arith.constant 0 : i32
    return %c0_i32, %c0_i32_0 : i32, i32
  }
  func.func @transform_1(%arg0: i32, %arg1: i32) -> (i32, i32) {
    %c0_i32 = arith.constant 0 : i32
    return %arg1, %arg0 : i32, i32
  }
  func.func @transform_2(%arg0: i32, %arg1: i32) -> (i32, i32) {
    %c0_i32 = arith.constant 0 : i32
    %c0_i32_0 = arith.constant 0 : i32
    return %c0_i32, %arg0 : i32, i32
  }
  func.func @transform_3(%arg0: i32, %arg1: i32) -> (i32, i32) {
    %c0_i32 = arith.constant 0 : i32
    %c0_i32_0 = arith.constant 0 : i32
    return %c0_i32, %arg0 : i32, i32
  }
  func.func @transform_4(%arg0: i32, %arg1: i32) -> (i32, i32) {
    %c0_i32 = arith.constant 0 : i32
    %c0_i32_0 = arith.constant 0 : i32
    %c0_i32_1 = arith.constant 0 : i32
    return %c0_i32, %c0_i32_0 : i32, i32
  }
  func.func @transform_5(%arg0: i32, %arg1: i32) -> (i32, i32) {
    %c0_i32 = arith.constant 0 : i32
    %c0_i32_0 = arith.constant 0 : i32
    %c0_i32_1 = arith.constant 0 : i32
    return %c0_i32, %c0_i32_0 : i32, i32
  }
  func.func @transform_6(%arg0: i32, %arg1: i32) -> (i32, i32) {
    %c0_i32 = arith.constant 0 : i32
    %c0_i32_0 = arith.constant 0 : i32
    return %c0_i32, %arg0 : i32, i32
  }
}

</mosaic_0001>

<bundles_post_ra>
// kernel: tpu_custom_call.1
= control target key start
LH: loop header
LB: loop body
LE: loop exit
PB: predicated region body
PF: predicated region fallthrough
CT: control target
= control target key end

     0   :  { %11 = vsyncpa [#allocation3], 0  ;;  %s488_s0 = inlined_call_operand.hbm [shape: bf16[16,128], index: 0, kind: input, shape index: {}]   ;;  %s489_s1 = inlined_call_operand.hbm [shape: bf16[128,128], index: 1, kind: input, shape index: {}]   ;;  %s490_s2 = inlined_call_operand.vmem [shape: f32[16,128], index: 2, kind: input, shape index: {}]   ;;  %s491_s3 = inlined_call_operand.vmem [shape: f32[16,128], index: 3, kind: input, shape index: {}]   ;;  %s492_s4 = inlined_call_operand.vmem [shape: f32[16,1], index: 4, kind: input, shape index: {}]   ;;  %s493_s5 = inlined_call_operand.vmem [shape: f32[16,1], index: 5, kind: input, shape index: {}]   ;;  %s494_s6 = inlined_call_operand.hbm [shape: f32[16,128], index: 6, kind: output, shape index: {}]  }
   0x1   :  { %12 = vsyncpa [#allocation6], 0 }
   0x2   :  { %13 = vsyncpa [#allocation4], 0  ;;  %s383_s21 = smov [#allocation2]   ;;  %s311_s25 = scalar_lea.hbm %s488_s0, 128 }
   0x3   :  { %s19_s22 = sshll.u32 %s383_s21, 4  ;;  %p312_p0 = scmp.ne.s32.totalorder %s488_s0, %s311_s25  ;;  %s20_s22 = int_to_ptr.vmem [resolvable:$true] %s19_s22 }
   0x4   :  { %p315_p1 = scmp.lt.u32.totalorder %s311_s25, %s488_s0 }
   0x6   :  { %p317_p2 = pnand %p315_p1, %p312_p0 }
   0x8   :  { %320 = shalt.err (!%p317_p2)
}
   0x9   :  { %s321_s30 = scalar_lea.vmem %s20_s22, 128  ;;  %p326_p4 = scmp.lt.s32.totalorder %s20_s22, %s20_s22 }
   0xa   :  { %p322_p3 = scmp.ne.s32.totalorder %s20_s22, %s321_s30  ;;  %p327_p5 = scmp.lt.s32.totalorder %s321_s30, %s321_s30 }
   0xc   :  { %p328_p6 = por %p327_p5, %p326_p4 }
   0xe   :  { %p329_p7 = pnand %p328_p6, %p322_p3 }
  0x10   :  { %332 = shalt.err (!%p329_p7)
}
  0x11   :  { %s384_s7 = smov 64   ;;  %s385_s8 = smov 4  }
  0x12   :  { %25 = dma.hbm_to_vmem [thread:$0]  %s488_s0, 128, %s20_s22, [#allocation3], %s384_s7, %s384_s7, %s385_s8  }
  0x13   :  { %s386_s11 = smov [#allocation5]   ;;  %s333_s15 = scalar_lea.hbm %s489_s1, 1024 }
  0x14   :  { %s31_s12 = sshll.u32 %s386_s11, 4  ;;  %p334_p8 = scmp.ne.s32.totalorder %s489_s1, %s333_s15  ;;  %s32_s12 = int_to_ptr.vmem [resolvable:$true] %s31_s12 }
  0x15   :  { %p337_p9 = scmp.lt.u32.totalorder %s333_s15, %s489_s1 }
  0x17   :  { %p339_p10 = pnand %p337_p9, %p334_p8 }
  0x19   :  { %342 = shalt.err (!%p339_p10)
}
  0x1a   :  { %s343_s20 = scalar_lea.vmem %s32_s12, 1024  ;;  %p348_p12 = scmp.lt.s32.totalorder %s32_s12, %s32_s12 }
  0x1b   :  { %p344_p11 = scmp.ne.s32.totalorder %s32_s12, %s343_s20  ;;  %p349_p13 = scmp.lt.s32.totalorder %s343_s20, %s343_s20 }
  0x1d   :  { %p350_p0 = por %p349_p13, %p348_p12 }
  0x1f   :  { %p351_p1 = pnand %p350_p0, %p344_p11 }
  0x21   :  { %354 = shalt.err (!%p351_p1)
}
  0x22   :  { %37 = dma.hbm_to_vmem [thread:$0]  %s489_s1, 1024, %s32_s12, [#allocation6], %s384_s7, %s384_s7, %s385_s8  }
  0x23   :  { %377 = dma.done.wait [#allocation3], 128  }
  0x24   :  { %378 = vsyncadd [#allocation3], 4294967168 }
  0x25   :  { %379 = dma.done.wait [#allocation6], 1024  }
  0x26   :  { %380 = vsyncadd [#allocation6], 4294966272  ;;  %v387_v0 = vmov 0.0   ;;  %vm388_vm0 = vmmov 0   ;;  %v389_v1 = vmov 0   ;;  %v298_v2 = vld [vmem:[#allocation5] sm:$0xff]  }
  0x27   :  { %266 = vmatprep.subr.bf16.mxu0 %v387_v0  ;;  %282 = vmatprep.mubr.msk.bf16.mxu0 %vm388_vm0, %v387_v0  ;;  %v299_v3 = vld [vmem:[#allocation5 + $0x8] sm:$0xff]   ;;  %v300_v4 = vld [vmem:[#allocation5 + $0x10] sm:$0xff]   ;;  %v202_v5 = vld [vmem:[%s493_s5] sm:$0xff]  ;;  %s390_s9 = smov [#allocation7]  }
  0x28   :  { %297 = vset.pattern.permute.xlu1 %v389_v1  ;;  %296 = vset.pattern.permute.xlu0 %v389_v1  ;;  %v188_v6 = vld [vmem:[%s492_s4] sm:$0xff]  ;;  %v203_v8 = vld [vmem:[%s493_s5 + $0x8] sm:$0xff]  ;;  %v303_v11 = vld [vmem:[#allocation5 + $0x28] sm:$0xff]   ;;  %s233_s10 = sshll.u32 %s390_s9, 4  ;;  %s234_s10 = int_to_ptr.vmem [resolvable:$true] %s233_s10 }
  0x29   :  { %267 = vmatpush3.bf16.msra.mxu0 %v298_v2  ;;  %v301_v7 = vld [vmem:[#allocation5 + $0x18] sm:$0xff]   ;;  %208 = vperm.xlu1 %297, %v202_v5   ;;  %v189_v9 = vld [vmem:[%s492_s4 + $0x8] sm:$0xff]  ;;  %v304_v12 = vld [vmem:[#allocation5 + $0x30] sm:$0xff]   ;;  %s355_s12 = scalar_lea.vmem %s234_s10, 256  ;;  %p360_p3 = scmp.lt.s32.totalorder %s234_s10, %s234_s10 }
  0x2a   :  { %268 = vmatprep.subr.bf16.mxu0 %v387_v0  ;;  %192 = vperm.xlu0 %296, %v188_v6   ;;  %v302_v10 = vld [vmem:[#allocation5 + $0x20] sm:$0xff]   ;;  %v305_v13 = vld [vmem:[#allocation5 + $0x38] sm:$0xff]   ;;  %p356_p2 = scmp.ne.s32.totalorder %s234_s10, %s355_s12  ;;  %p361_p4 = scmp.lt.s32.totalorder %s355_s12, %s355_s12 }
  0x2b   :  { %v306_v14 = vld [vmem:[#allocation2] sm:$0xff]   ;;  %v205_v21 = vld [vmem:[%s490_s2 + $0x8] sm:$0xff] }
  0x2c   :  { %v204_v18 = vld [vmem:[%s490_s2] sm:$0xff]  ;;  %v221_v33 = vld [vmem:[%s491_s3 + $0x8] sm:$0xff]  ;;  %p362_p5 = por %p361_p4, %p360_p3 }
  0x2d   :  { %269 = vmatpush3.bf16.msra.mxu0 %v299_v3  ;;  %213 = vperm.xlu1 %297, %v203_v8   ;;  %v220_v31 = vld [vmem:[%s491_s3] sm:$0xff] }
  0x2e   :  { %270 = vmatprep.subr.bf16.mxu0 %v387_v0  ;;  %197 = vperm.xlu0 %296, %v189_v9   ;;  %p363_p6 = pnand %p362_p5, %p356_p2 }
  0x31   :  { %271 = vmatpush3.bf16.msra.mxu0 %v300_v4 }
  0x32   :  { %272 = vmatprep.subr.bf16.mxu0 %v387_v0 }
  0x35   :  { %273 = vmatpush3.bf16.msra.mxu0 %v301_v7 }
  0x36   :  { %274 = vmatprep.subr.bf16.mxu0 %v387_v0 }
  0x39   :  { %275 = vmatpush3.bf16.msra.mxu0 %v302_v10 }
  0x3a   :  { %276 = vmatprep.subr.bf16.mxu0 %v387_v0 }
  0x3d   :  { %277 = vmatpush3.bf16.msra.mxu0 %v303_v11 }
  0x3e   :  { %278 = vmatprep.subr.bf16.mxu0 %v387_v0 }
  0x41   :  { %279 = vmatpush3.bf16.msra.mxu0 %v304_v12 }
  0x42   :  { %280 = vmatprep.subr.bf16.mxu0 %v387_v0 }
  0x45   :  { %281 = vmatpush3.bf16.msra.mxu0 %v305_v13 }
  0x48   :  { %283 = vmatmul.mubr.bf16.vlgmr.msra.gmra.mrb[0].mxu0 %v306_v14 }
  0xa8   :  { %v209_v15 = vpop.permute.xlu1 %208 }
  0xa9   :  { %v193_v16 = vpop.permute.xlu0 %192  ;;  %v216_v24 = vmul.f32 %v209_v15, %v204_v18 }
  0xac   :  { %v214_v22 = vpop.permute.xlu1 %213 }
  0xad   :  { %v198_v26 = vpop.permute.xlu0 %197  ;;  %v217_v28 = vmul.f32 %v214_v22, %v205_v21 }
 0x11b   :  { %v172_v17 = vpop.f32.mrb[0].mxu0 }
 0x11c   :  { %v284_v19 = vpop.f32.mrb[1].mxu0  ;;  %v200_v25 = vadd.f32 %v193_v16, %v172_v17 }
 0x11d   :  { %v175_v20 = vpop.f32.mrb[2].mxu0 }
 0x11e   :  { %v285_v23 = vpop.f32.mrb[3].mxu0  ;;  %v218_v27 = vadd.f32 %v216_v24, %v200_v25  ;;  %v201_v29 = vadd.f32 %v198_v26, %v175_v20 }
 0x120   :  { %307 = vtanh.f32 %v218_v27  ;;  %v219_v30 = vadd.f32 %v217_v28, %v201_v29 }
 0x122   :  { %309 = vtanh.f32 %v219_v30 }
 0x12a   :  { %v308_v32 = vpop.eup %307 }
 0x12b   :  { %v224_v34 = vadd.f32 %v308_v32, %v220_v31 }
 0x12c   :  { %v310_v35 = vpop.eup %309 }
 0x12d   :  { %226 = vst [vmem:[#allocation7] sm:$0xff] %v224_v34  ;;  %v225_v36 = vadd.f32 %v310_v35, %v221_v33 }
 0x12f   :  { %227 = vst [vmem:[#allocation7 + $0x8] sm:$0xff] %v225_v36 }
 0x130   :  { %366 = shalt.err (!%p363_p6)
}
 0x131   :  { %s367_s15 = scalar_lea.hbm %s494_s6, 256 }
 0x132   :  { %p368_p7 = scmp.ne.s32.totalorder %s494_s6, %s367_s15  ;;  %p371_p8 = scmp.lt.u32.totalorder %s367_s15, %s494_s6 }
 0x134   :  { %p373_p9 = pnand %p371_p8, %p368_p7 }
 0x136   :  { %376 = shalt.err (!%p373_p9)
}
 0x137   :  { %s391_s19 = smov 128   ;;  %s392_s20 = smov 8  }
 0x138   :  { %239 = dma.vmem_to_hbm [thread:$0]  %s234_s10, 256, %s494_s6, [#allocation4], %s391_s19, %s391_s19, %s392_s20  }
 0x139   :  { %381 = dma.done.wait [#allocation4], 256  }
 0x13a   :  { %382 = vsyncadd [#allocation4], 4294967040 }
 0x13b   :  { %243 = vsyncpa [#allocation3], 1 }
 0x13c   :  { %244 = vsyncpa [#allocation6], 1 }
 0x13d   :  { %245 = vsyncpa [#allocation4], 1 }

</bundles_post_ra>
